<compile_context>
chip_gen: v7x
topology: tpu7x:2x2x1
jax: 0.10.0
libtpu: 0.0.40
codegen_flags: <defaults>
</compile_context>

<pallas_src>
import jax
import jax.numpy as jnp
from jax.experimental import pallas as pl
from jax.experimental.pallas import tpu as pltpu


# ----------------------------------------------------------------------------
# Pallas kernel: fused spectral 1x1 conv + ReLU, two lane-dense output heads
# ----------------------------------------------------------------------------

def _fu_conv_relu_kernel(x_ref, wre_ref, wim_ref, ore_ref, oim_ref):
    """ore = relu(x @ Wre); oim = relu(x @ Wim).

    x_ref   : (TM, 2*Cin)   interleaved [re_c0, im_c0, re_c1, im_c1, ...] spectrum
    wre_ref : (2*Cin, Cout) weight columns for real-part outputs
    wim_ref : (2*Cin, Cout) weight columns for imag-part outputs
    ore_ref : (TM, Cout)    real output plane (f32)
    oim_ref : (TM, Cout)    imag output plane (f32)
    """
    x = x_ref[...]
    re = jnp.dot(x, wre_ref[...], preferred_element_type=jnp.float32)
    im = jnp.dot(x, wim_ref[...], preferred_element_type=jnp.float32)
    ore_ref[...] = jnp.maximum(re, 0.0)
    oim_ref[...] = jnp.maximum(im, 0.0)


def pallas_fu_conv_relu(x, wre, wim, *, tile_m=None,
                        vmem_budget_bytes=48 * 1024 * 1024):
    """x: (M, 2*Cin); wre, wim: (2*Cin, Cout). Returns (y_re, y_im), each (M, Cout) f32."""
    M, K = x.shape
    Cout = wre.shape[1]
    in_bytes = jnp.dtype(x.dtype).itemsize
    if tile_m is None:
        tile_m = 4096 if in_bytes == 2 else 2048   # bf16 gets the bigger tile

    def _rup(a, b):
        return -(-a // b) * b

    def _footprint(tm):
        # double-buffered input + two double-buffered f32 outputs + weights
        return (2 * tm * K * in_bytes
                + 2 * 2 * tm * Cout * 4
                + 2 * 2 * K * Cout * in_bytes)

    if M <= tile_m:
        # >=2 balanced grid steps once M is big enough to matter so v7x's second
        # TensorCore is not left idle under "parallel" megacore sharding.
        tm = _rup(pl.cdiv(M, 2), 16) if M >= 1024 else M
    else:
        tm = tile_m
    # Shrink the tile until the double-buffered footprint fits the VMEM budget
    # (keeps v7x's 64 MiB physical VMEM comfortable; no-op at LaMa-scale C).
    while tm > 256 and _footprint(tm) > int(vmem_budget_bytes * 0.85):
        tm = max(256, _rup(tm // 2, 16))

    grid_m = pl.cdiv(M, tm)   # no padding: Pallas masks the partial last block

    y_re, y_im = pl.pallas_call(
        _fu_conv_relu_kernel,
        out_shape=(jax.ShapeDtypeStruct((M, Cout), jnp.float32),
                   jax.ShapeDtypeStruct((M, Cout), jnp.float32)),
        grid=(grid_m,),
        in_specs=[pl.BlockSpec((tm, K), lambda m: (m, 0)),
                  pl.BlockSpec((K, Cout), lambda m: (0, 0)),
                  pl.BlockSpec((K, Cout), lambda m: (0, 0))],
        out_specs=(pl.BlockSpec((tm, Cout), lambda m: (m, 0)),
                   pl.BlockSpec((tm, Cout), lambda m: (m, 0))),
        compiler_params=pltpu.CompilerParams(
            dimension_semantics=("parallel",),
            vmem_limit_bytes=vmem_budget_bytes),
        cost_estimate=pl.CostEstimate(
            flops=2 * M * K * (2 * Cout),
            bytes_accessed=(M * K * in_bytes
                            + 2 * K * Cout * in_bytes
                            + 2 * M * Cout * 4),
            transcendentals=0),
    )(x, wre, wim)
    return y_re, y_im


# ----------------------------------------------------------------------------
# Weight re-layout (trace-time, tiny array):
#   torch conv weight w[o, k] with input channel k = 2*c_in + {0: real, 1: imag}
#   (exactly the interleaved spectrum layout) and output channel
#   o = 2*c_out + {0: real, 1: imag}.
# ----------------------------------------------------------------------------

def split_fu_weight(w):
    """w: (2*Cout, 2*Cin) squeezed 1x1 conv weight -> (Wre, Wim), each (2*Cin, Cout)."""
    wre = jnp.transpose(w[0::2, :])   # rows o=2*c_out   -> real-part outputs
    wim = jnp.transpose(w[1::2, :])   # rows o=2*c_out+1 -> imag-part outputs
    return wre, wim


# ----------------------------------------------------------------------------
# FourierUnit forward
# ----------------------------------------------------------------------------

def fourier_unit(x_nchw, weight, *, use_bf16_matmul=True):
    """FourierUnit.forward.

    x_nchw : (B, Cin, H, W) float32 (PyTorch NCHW convention)
    weight : (2*Cout, 2*Cin) float32  (the 1x1 conv weight, bias=False)
    returns (B, Cout, H, W) float32

    use_bf16_matmul quantizes the matmul inputs to bf16 (f32 accumulation and
    f32 outputs) — recommended on v6e/v7x for bandwidth; set False to match the
    PyTorch f32 reference numerics.
    """
    B, Cin, H, W = x_nchw.shape
    Cout = weight.shape[0] // 2

    # NHWC so channels sit on the TPU lane axis for the matmul path.
    x = jnp.transpose(x_nchw, (0, 2, 3, 1)).astype(jnp.float32)

    # TODO(synk): FFT has no Pallas primitive; jnp.fft glue.
    ff = jnp.fft.rfftn(x, axes=(1, 2), norm='ortho')          # (B, H, W2, Cin) c64
    W2 = ff.shape[2]
    M = B * H * W2

    # Real/imag channel interleave in ONE fused pass (equivalent to bitcasting
    # the complex64 spectrum to f32 pairs): columns are [re_c0, im_c0, re_c1, ...].
    dt = jnp.bfloat16 if use_bf16_matmul else jnp.float32
    x_flat = jnp.stack((ff.real, ff.imag), axis=-1).reshape(M, 2 * Cin).astype(dt)

    wre, wim = split_fu_weight(weight)
    wre = wre.astype(dt)
    wim = wim.astype(dt)

    y_re, y_im = pallas_fu_conv_relu(x_flat, wre, wim)         # 2 x (M, Cout) f32

    yc = jax.lax.complex(y_re.reshape(B, H, W2, Cout),
                         y_im.reshape(B, H, W2, Cout))
    out = jnp.fft.irfftn(yc, s=(H, W), axes=(1, 2), norm='ortho')    # (B, H, W, Cout)
    return jnp.transpose(out, (0, 3, 1, 2)).astype(jnp.float32)      # -> NCHW


# ----------------------------------------------------------------------------
# Pure-JAX reference (mirrors the torch forward op-for-op) for validation
# ----------------------------------------------------------------------------

def fourier_unit_ref(x, weight):
    B, C, H, W = x.shape
    Cout = weight.shape[0] // 2
    ff = jnp.fft.rfftn(x, axes=(-2, -1), norm='ortho')        # (B, C, H, W2)
    W2 = ff.shape[-1]
    z = jnp.stack([ff.real, ff.imag], axis=2).reshape(B, 2 * C, H, W2)
    y = jnp.einsum('bkhw,ok->bohw', z, weight)                # 1x1 conv, bias=False
    y = jnp.maximum(y, 0.0)                                   # ReLU (bn unused in fwd)
    y = y.reshape(B, Cout, 2, H, W2)
    yc = jax.lax.complex(y[:, :, 0], y[:, :, 1])
    return jnp.fft.irfftn(yc, s=(H, W), axes=(-2, -1), norm='ortho')


# ----------------------------------------------------------------------------

if __name__ == "__main__":
    key = jax.random.PRNGKey(0)
    kx, kw = jax.random.split(key)

    B, C, H, W = 2, 4, 16, 16
    x = jax.random.normal(kx, (B, C, H, W), jnp.float32)                 # NCHW
    weight = 0.1 * jax.random.normal(kw, (2 * C, 2 * C), jnp.float32)    # 1x1 conv

    ref = fourier_unit_ref(x, weight)

    # f32 path: matches the PyTorch reference numerics (tolerance covers the
    # MXU default-precision pass vs XLA's einsum).
    out_f32 = jax.jit(lambda a, w: fourier_unit(a, w, use_bf16_matmul=False))(x, weight)
    out_f32 = jax.block_until_ready(out_f32)
    assert out_f32.shape == (B, C, H, W), out_f32.shape
    assert bool(jnp.all(jnp.isfinite(out_f32)))
    assert bool(jnp.allclose(out_f32, ref, atol=3e-2, rtol=1e-2)), \
        float(jnp.max(jnp.abs(out_f32 - ref)))

    # bf16-input path (default, the bandwidth-optimized variant): inputs are
    # quantized to bf16 before the MXU, so compare with a looser tolerance.
    out_bf16 = jax.jit(fourier_unit)(x, weight)
    out_bf16 = jax.block_until_ready(out_bf16)
    assert out_bf16.shape == (B, C, H, W), out_bf16.shape
    assert bool(jnp.all(jnp.isfinite(out_bf16)))
    assert bool(jnp.allclose(out_bf16, ref, atol=5e-2, rtol=5e-2)), \
        float(jnp.max(jnp.abs(out_bf16 - ref)))

    print("KERNEL_OK")
</pallas_src>

<mosaic_0001>
module attributes {stable_mosaic.version = 11 : i64} {
  func.func @_fu_conv_relu_kernel(%arg0: i32, %arg1: memref<288x8xf32, #tpu.memory_space<vmem>>, %arg2: memref<8x4xf32, #tpu.memory_space<vmem>>, %arg3: memref<8x4xf32, #tpu.memory_space<vmem>>, %arg4: memref<288x4xf32, #tpu.memory_space<vmem>>, %arg5: memref<288x4xf32, #tpu.memory_space<vmem>>) attributes {dimension_semantics = [#tpu.dimension_semantics<parallel>], iteration_bounds = array<i64: 1>, scalar_prefetch = 0 : i64, scratch_operands = 0 : i64, tpu.core_type = #tpu.core_type<tc>, window_params = [{transform_indices = @transform_0, window_bounds = array<i64: 288, 8>}, {pipeline_mode = #tpu.pipeline_mode<synchronous>, transform_indices = @transform_1, window_bounds = array<i64: 8, 4>}, {pipeline_mode = #tpu.pipeline_mode<synchronous>, transform_indices = @transform_2, window_bounds = array<i64: 8, 4>}, {transform_indices = @transform_3, window_bounds = array<i64: 288, 4>}, {transform_indices = @transform_4, window_bounds = array<i64: 288, 4>}]} {
    %c0 = arith.constant 0 : index
    %c0_0 = arith.constant 0 : index
    %0 = vector.load %arg1[%c0, %c0_0] : memref<288x8xf32, #tpu.memory_space<vmem>>, vector<288x8xf32>
    %c0_1 = arith.constant 0 : index
    %c0_2 = arith.constant 0 : index
    %1 = vector.load %arg2[%c0_1, %c0_2] : memref<8x4xf32, #tpu.memory_space<vmem>>, vector<8x4xf32>
    %cst = arith.constant dense<0.000000e+00> : vector<288x4xf32>
    %2 = tpu.matmul %0, %1, %cst {dimension_numbers = #tpu.dot_dimension_numbers<[1], [0], [0], [1], [0, 0, 1, 1], [], []>} : vector<288x8xf32>, vector<8x4xf32>, vector<288x4xf32> -> vector<288x4xf32>
    %c0_3 = arith.constant 0 : index
    %c0_4 = arith.constant 0 : index
    %3 = vector.load %arg3[%c0_3, %c0_4] : memref<8x4xf32, #tpu.memory_space<vmem>>, vector<8x4xf32>
    %cst_5 = arith.constant dense<0.000000e+00> : vector<288x4xf32>
    %4 = tpu.matmul %0, %3, %cst_5 {dimension_numbers = #tpu.dot_dimension_numbers<[1], [0], [0], [1], [0, 0, 1, 1], [], []>} : vector<288x8xf32>, vector<8x4xf32>, vector<288x4xf32> -> vector<288x4xf32>
    %cst_6 = arith.constant 0.000000e+00 : f32
    %5 = vector.broadcast %cst_6 : f32 to vector<288x4xf32>
    %6 = arith.maximumf %2, %5 : vector<288x4xf32>
    %c0_7 = arith.constant 0 : index
    %c0_8 = arith.constant 0 : index
    %7 = vector.load %arg4[%c0_7, %c0_8] : memref<288x4xf32, #tpu.memory_space<vmem>>, vector<288x4xf32>
    tpu.vector_store %arg4[%c0_7, %c0_8], %6 {strides = array<i32>} : memref<288x4xf32, #tpu.memory_space<vmem>>, vector<288x4xf32>,
    %cst_9 = arith.constant 0.000000e+00 : f32
    %8 = vector.broadcast %cst_9 : f32 to vector<288x4xf32>
    %9 = arith.maximumf %4, %8 : vector<288x4xf32>
    %c0_10 = arith.constant 0 : index
    %c0_11 = arith.constant 0 : index
    %10 = vector.load %arg5[%c0_10, %c0_11] : memref<288x4xf32, #tpu.memory_space<vmem>>, vector<288x4xf32>
    tpu.vector_store %arg5[%c0_10, %c0_11], %9 {strides = array<i32>} : memref<288x4xf32, #tpu.memory_space<vmem>>, vector<288x4xf32>,
    return
  }
  func.func @transform_0(%arg0: i32) -> (i32, i32) {
    %c0_i32 = arith.constant 0 : i32
    %c0_i32_0 = arith.constant 0 : i32
    return %arg0, %c0_i32 : i32, i32
  }
  func.func @transform_1(%arg0: i32) -> (i32, i32) {
    %c0_i32 = arith.constant 0 : i32
    %c0_i32_0 = arith.constant 0 : i32
    %c0_i32_1 = arith.constant 0 : i32
    return %c0_i32, %c0_i32_0 : i32, i32
  }
  func.func @transform_2(%arg0: i32) -> (i32, i32) {
    %c0_i32 = arith.constant 0 : i32
    %c0_i32_0 = arith.constant 0 : i32
    %c0_i32_1 = arith.constant 0 : i32
    return %c0_i32, %c0_i32_0 : i32, i32
  }
  func.func @transform_3(%arg0: i32) -> (i32, i32) {
    %c0_i32 = arith.constant 0 : i32
    %c0_i32_0 = arith.constant 0 : i32
    return %arg0, %c0_i32 : i32, i32
  }
  func.func @transform_4(%arg0: i32) -> (i32, i32) {
    %c0_i32 = arith.constant 0 : i32
    %c0_i32_0 = arith.constant 0 : i32
    return %arg0, %c0_i32 : i32, i32
  }
}

</mosaic_0001>

<bundles_post_ra>
// kernel: reverse.1
= control target key start
LH: loop header
LB: loop body
LE: loop exit
PB: predicated region body
PF: predicated region fallthrough
CT: control target
= control target key end

     0   :  { %v71_v3 = vlaneseq  ;;  %v64_v9 = vld [vmem:[#allocation0 + $0x7] ss:$-1 sm:$0xff]  ;;  %v78_v12 = vld [vmem:[#allocation0 + $0x17] ss:$-1 sm:$0xff]  ;;  %s329_s0 = inlined_call_operand.vmem [shape: f32[2,4,16,7], index: 0, kind: input, shape index: {}]   ;;  %s330_s1 = inlined_call_operand.vmem [shape: f32[2,4,16,7], index: 1, kind: output, shape index: {}]  }
   0x1   :  { %v44_v0 = vld [vmem:[%s329_s0] sm:$0xff]  ;;  %v46_v1 = vld [vmem:[%s329_s0 + $0x8] sm:$0xff]  ;;  %v48_v2 = vld [vmem:[%s329_s0 + $0x10] sm:$0xff]  ;;  %v65_v10 = vrot.slane %v64_v9, 1  ;;  %v79_v14 = vrot.slane %v78_v12, 1 }
   0x2   :  { %45 = vst [vmem:[#allocation0 + $0x8] sm:$0xff] %v44_v0  ;;  %47 = vst [vmem:[#allocation0 + $0x18] sm:$0xff] %v46_v1  ;;  %v50_v4 = vld [vmem:[%s329_s0 + $0x18] sm:$0xff]  ;;  %v52_v5 = vld [vmem:[%s329_s0 + $0x20] sm:$0xff]  ;;  %v72_v11 = vshrl.u32 %v71_v3, 7 }
   0x3   :  { %49 = vst [vmem:[#allocation0 + $0x28] sm:$0xff] %v48_v2  ;;  %v54_v6 = vld [vmem:[%s329_s0 + $0x28] sm:$0xff]  ;;  %51 = vst [vmem:[#allocation0 + $0x38] sm:$0xff] %v50_v4  ;;  %v56_v7 = vld [vmem:[%s329_s0 + $0x30] sm:$0xff] }
   0x4   :  { %53 = vst [vmem:[#allocation0 + $0x48] sm:$0xff] %v52_v5  ;;  %55 = vst [vmem:[#allocation0 + $0x58] sm:$0xff] %v54_v6  ;;  %v58_v8 = vld [vmem:[%s329_s0 + $0x38] sm:$0xff]  ;;  %v92_v13 = vld [vmem:[#allocation0 + $0x27] ss:$-1 sm:$0xff]  ;;  %vm73_vm0 = vcmp.lt.s32.totalorder %v72_v11, 7 }
   0x5   :  { %57 = vst [vmem:[#allocation0 + $0x68] sm:$0xff] %v56_v7  ;;  %59 = vst [vmem:[#allocation0 + $0x78] sm:$0xff] %v58_v8  ;;  %v93_v15 = vrot.slane %v92_v13, 1  ;;  %v106_v16 = vld [vmem:[#allocation0 + $0x37] ss:$-1 sm:$0xff] }
   0x6   :  { %66 = vst [vmem:[#allocation1] sm:$0xff] %v65_v10  ;;  %v107_v17 = vrot.slane %v106_v16, 1  ;;  %v120_v18 = vld [vmem:[#allocation0 + $0x47] ss:$-1 sm:$0xff]  ;;  %v134_v19 = vld [vmem:[#allocation0 + $0x57] ss:$-1 sm:$0xff] }
   0x7   :  { %80 = vst [vmem:[#allocation1 + $0x8] sm:$0xff] %v79_v14  ;;  %94 = vst [vmem:[#allocation1 + $0x10] sm:$0xff] %v93_v15  ;;  %v121_v20 = vrot.slane %v120_v18, 1  ;;  %v135_v21 = vrot.slane %v134_v19, 1  ;;  %v148_v22 = vld [vmem:[#allocation0 + $0x67] ss:$-1 sm:$0xff] }
   0x8   :  { %v162_v23 = vld [vmem:[#allocation0 + $0x77] ss:$-1 sm:$0xff]  ;;  %108 = vst [vmem:[#allocation1 + $0x18] sm:$0xff] %v107_v17  ;;  %v149_v24 = vrot.slane %v148_v22, 1 }
   0x9   :  { %v163_v25 = vrot.slane %v162_v23, 1  ;;  %v69_v26 = vld [vmem:[#allocation0 + $0xf] ss:$-1 sm:$0xff]  ;;  %v83_v27 = vld [vmem:[#allocation0 + $0x1f] ss:$-1 sm:$0xff]  ;;  %122 = vst [vmem:[#allocation1 + $0x20] sm:$0xff] %v121_v20 }
   0xa   :  { %v97_v28 = vld [vmem:[#allocation0 + $0x2f] ss:$-1 sm:$0xff]  ;;  %136 = vst [vmem:[#allocation1 + $0x28] sm:$0xff] %v135_v21  ;;  %v70_v29 = vrot.slane %v69_v26, 1  ;;  %v84_v30 = vrot.slane %v83_v27, 1  ;;  %150 = vst [vmem:[#allocation1 + $0x30] sm:$0xff] %v149_v24 }
   0xb   :  { %v98_v31 = vrot.slane %v97_v28, 1  ;;  %v111_v32 = vld [vmem:[#allocation0 + $0x3f] ss:$-1 sm:$0xff]  ;;  %164 = vst [vmem:[#allocation1 + $0x38] sm:$0xff] %v163_v25  ;;  %v125_v34 = vld [vmem:[#allocation0 + $0x4f] ss:$-1 sm:$0xff] }
   0xc   :  { %v112_v33 = vrot.slane %v111_v32, 1  ;;  %v139_v35 = vld [vmem:[#allocation0 + $0x5f] ss:$-1 sm:$0xff]  ;;  %74 = vst.msk [vmem:[#allocation1] sm:$0xff] %vm73_vm0, %v70_v29  ;;  %88 = vst.msk [vmem:[#allocation1 + $0x8] sm:$0xff] %vm73_vm0, %v84_v30  ;;  %v126_v36 = vrot.slane %v125_v34, 1 }
   0xd   :  { %102 = vst.msk [vmem:[#allocation1 + $0x10] sm:$0xff] %vm73_vm0, %v98_v31  ;;  %v140_v37 = vrot.slane %v139_v35, 1  ;;  %v153_v38 = vld [vmem:[#allocation0 + $0x6f] ss:$-1 sm:$0xff]  ;;  %v167_v39 = vld [vmem:[#allocation0 + $0x7f] ss:$-1 sm:$0xff] }
   0xe   :  { %116 = vst.msk [vmem:[#allocation1 + $0x18] sm:$0xff] %vm73_vm0, %v112_v33  ;;  %v154_v40 = vrot.slane %v153_v38, 1  ;;  %v168_v41 = vrot.slane %v167_v39, 1  ;;  %130 = vst.msk [vmem:[#allocation1 + $0x20] sm:$0xff] %vm73_vm0, %v126_v36 }
   0xf   :  { %144 = vst.msk [vmem:[#allocation1 + $0x28] sm:$0xff] %vm73_vm0, %v140_v37 }
  0x10   :  { %158 = vst.msk [vmem:[#allocation1 + $0x30] sm:$0xff] %vm73_vm0, %v154_v40  ;;  %172 = vst.msk [vmem:[#allocation1 + $0x38] sm:$0xff] %vm73_vm0, %v168_v41 }
  0x13   :  { %v214_v42 = vld [vmem:[#allocation1] sm:$0xff]  ;;  %v216_v43 = vld [vmem:[#allocation1 + $0x8] sm:$0xff] }
  0x14   :  { %v218_v44 = vld [vmem:[#allocation1 + $0x10] sm:$0xff]  ;;  %215 = vst [vmem:[%s330_s1] sm:$0xff] %v214_v42  ;;  %217 = vst [vmem:[%s330_s1 + $0x8] sm:$0xff] %v216_v43 }
  0x15   :  { %219 = vst [vmem:[%s330_s1 + $0x10] sm:$0xff] %v218_v44  ;;  %v220_v45 = vld [vmem:[#allocation1 + $0x18] sm:$0xff]  ;;  %v222_v46 = vld [vmem:[#allocation1 + $0x20] sm:$0xff] }
  0x16   :  { %221 = vst [vmem:[%s330_s1 + $0x18] sm:$0xff] %v220_v45  ;;  %v224_v47 = vld [vmem:[#allocation1 + $0x28] sm:$0xff]  ;;  %223 = vst [vmem:[%s330_s1 + $0x20] sm:$0xff] %v222_v46 }
  0x17   :  { %225 = vst [vmem:[%s330_s1 + $0x28] sm:$0xff] %v224_v47  ;;  %v226_v48 = vld [vmem:[#allocation1 + $0x30] sm:$0xff]  ;;  %v228_v49 = vld [vmem:[#allocation1 + $0x38] sm:$0xff] }
  0x18   :  { %227 = vst [vmem:[%s330_s1 + $0x30] sm:$0xff] %v226_v48  ;;  %229 = vst [vmem:[%s330_s1 + $0x38] sm:$0xff] %v228_v49 }

// kernel: _lambda_.1
= control target key start
LH: loop header
LB: loop body
LE: loop exit
PB: predicated region body
PF: predicated region fallthrough
CT: control target
= control target key end

     0   :  { %vm53_vm0 = vcmask 64512   ;;  %vm689_vm1 = vcmask 31744   ;;  %s1563_s1 = inlined_call_operand.vmem [shape: f32[8,4], index: 1, kind: input, shape index: {}]   ;;  %s1564_s2 = inlined_call_operand.vmem [shape: f32[8,4], index: 2, kind: input, shape index: {}]   ;;  %s1565_s0 = inlined_call_operand.vmem [shape: f32[288,8], index: 0, kind: input, shape index: {}]   ;;  %s1566_s3 = inlined_call_operand.vmem [shape: f32[288,4], index: 3, kind: output, shape index: {0}]   ;;  %s1567_s4 = inlined_call_operand.vmem [shape: f32[288,4], index: 4, kind: output, shape index: {1}]  }
   0x1   :  { %v52_v0 = vld [vmem:[%s1563_s1] sm:$0xff]  ;;  %v17_v3 = vld [vmem:[%s1565_s0 + $0x8] sm:$0xff]  ;;  %v18_v4 = vld [vmem:[%s1565_s0 + $0x10] sm:$0xff] }
   0x2   :  { %v407_v1 = vld [vmem:[%s1564_s2] sm:$0xff]  ;;  %952 = vmatprep.subr.mxu0 %v52_v0  ;;  %v19_v5 = vld [vmem:[%s1565_s0 + $0x18] sm:$0xff]  ;;  %v21_v7 = vld [vmem:[%s1565_s0 + $0x28] sm:$0xff] }
   0x3   :  { %v16_v2 = vld [vmem:[%s1565_s0] sm:$0xff]  ;;  %1008 = vmatprep.subr.mxu1 %v407_v1  ;;  %953 = vmatpush3.msra.mxu0 %v52_v0  ;;  %v22_v8 = vld [vmem:[%s1565_s0 + $0x30] sm:$0xff]  ;;  %v23_v9 = vld [vmem:[%s1565_s0 + $0x38] sm:$0xff] }
   0x4   :  { %954 = vmatprep.mubr.msk.f32.mxu0 %vm53_vm0, %v16_v2  ;;  %1009 = vmatpush3.msra.mxu1 %v407_v1  ;;  %v20_v6 = vld [vmem:[%s1565_s0 + $0x20] sm:$0xff]  ;;  %v25_v11 = vld [vmem:[%s1565_s0 + $0x48] sm:$0xff]  ;;  %v26_v12 = vld [vmem:[%s1565_s0 + $0x50] sm:$0xff] }
   0x5   :  { %1010 = vmatprep.mubr.msk.f32.mxu1 %vm53_vm0, %v16_v2  ;;  %955 = vmatmul.mubr.msk.f32.vlgmr.msra.gmra.mrb[0].mxu0 %vm53_vm0, %v17_v3  ;;  %v24_v10 = vld [vmem:[%s1565_s0 + $0x40] sm:$0xff]  ;;  %v27_v13 = vld [vmem:[%s1565_s0 + $0x58] sm:$0xff]  ;;  %v29_v15 = vld [vmem:[%s1565_s0 + $0x68] sm:$0xff] }
   0x6   :  { %1011 = vmatmul.mubr.msk.f32.vlgmr.msra.gmra.mrb[0].mxu1 %vm53_vm0, %v17_v3  ;;  %957 = vmatprep.mubr.msk.f32.mxu0 %vm53_vm0, %v18_v4  ;;  %v28_v14 = vld [vmem:[%s1565_s0 + $0x60] sm:$0xff]  ;;  %v30_v16 = vld [vmem:[%s1565_s0 + $0x70] sm:$0xff]  ;;  %v31_v17 = vld [vmem:[%s1565_s0 + $0x78] sm:$0xff] }
   0x7   :  { %1013 = vmatprep.mubr.msk.f32.mxu1 %vm53_vm0, %v18_v4  ;;  %v32_v18 = vld [vmem:[%s1565_s0 + $0x80] sm:$0xff]  ;;  %v33_v19 = vld [vmem:[%s1565_s0 + $0x88] sm:$0xff]  ;;  %v34_v20 = vld [vmem:[%s1565_s0 + $0x90] sm:$0xff] }
   0x8   :  { %v35_v21 = vld [vmem:[%s1565_s0 + $0x98] sm:$0xff]  ;;  %v36_v22 = vld [vmem:[%s1565_s0 + $0xa0] sm:$0xff]  ;;  %v37_v23 = vld [vmem:[%s1565_s0 + $0xa8] sm:$0xff] }
   0x9   :  { %958 = vmatmul.mubr.msk.f32.gmra.mrb[2].mxu0 %vm53_vm0, %v19_v5  ;;  %v38_v24 = vld [vmem:[%s1565_s0 + $0xb0] sm:$0xff]  ;;  %v39_v25 = vld [vmem:[%s1565_s0 + $0xb8] sm:$0xff]  ;;  %v40_v26 = vld [vmem:[%s1565_s0 + $0xc0] sm:$0xff] }
   0xa   :  { %1014 = vmatmul.mubr.msk.f32.gmra.mrb[2].mxu1 %vm53_vm0, %v19_v5  ;;  %960 = vmatprep.mubr.msk.f32.mxu0 %vm53_vm0, %v20_v6  ;;  %v41_v27 = vld [vmem:[%s1565_s0 + $0xc8] sm:$0xff]  ;;  %v42_v28 = vld [vmem:[%s1565_s0 + $0xd0] sm:$0xff]  ;;  %v43_v29 = vld [vmem:[%s1565_s0 + $0xd8] sm:$0xff] }
   0xb   :  { %1016 = vmatprep.mubr.msk.f32.mxu1 %vm53_vm0, %v20_v6  ;;  %v44_v30 = vld [vmem:[%s1565_s0 + $0xe0] sm:$0xff]  ;;  %v45_v31 = vld [vmem:[%s1565_s0 + $0xe8] sm:$0xff]  ;;  %v46_v32 = vld [vmem:[%s1565_s0 + $0xf0] sm:$0xff] }
   0xc   :  { %v47_v33 = vld [vmem:[%s1565_s0 + $0xf8] sm:$0xff]  ;;  %v48_v34 = vld [vmem:[%s1565_s0 + $0x100] sm:$0xff]  ;;  %v49_v35 = vld [vmem:[%s1565_s0 + $0x108] sm:$0xff] }
   0xd   :  { %961 = vmatmul.mubr.msk.f32.gmra.mrb[4].mxu0 %vm53_vm0, %v21_v7  ;;  %v50_v36 = vld [vmem:[%s1565_s0 + $0x110] sm:$0xff]  ;;  %v51_v37 = vld [vmem:[%s1565_s0 + $0x118] sm:$0xff] }
   0xe   :  { %1017 = vmatmul.mubr.msk.f32.gmra.mrb[4].mxu1 %vm53_vm0, %v21_v7  ;;  %963 = vmatprep.mubr.msk.f32.mxu0 %vm53_vm0, %v22_v8 }
   0xf   :  { %1019 = vmatprep.mubr.msk.f32.mxu1 %vm53_vm0, %v22_v8 }
  0x11   :  { %964 = vmatmul.mubr.msk.f32.gmra.mrb[6].mxu0 %vm53_vm0, %v23_v9 }
  0x12   :  { %1020 = vmatmul.mubr.msk.f32.gmra.mrb[6].mxu1 %vm53_vm0, %v23_v9  ;;  %966 = vmatprep.mubr.msk.f32.mxu0 %vm53_vm0, %v24_v10 }
  0x13   :  { %1022 = vmatprep.mubr.msk.f32.mxu1 %vm53_vm0, %v24_v10 }
  0x15   :  { %967 = vmatmul.mubr.msk.f32.gmra.mrb[8].mxu0 %vm53_vm0, %v25_v11 }
  0x16   :  { %1023 = vmatmul.mubr.msk.f32.gmra.mrb[8].mxu1 %vm53_vm0, %v25_v11  ;;  %969 = vmatprep.mubr.msk.f32.mxu0 %vm53_vm0, %v26_v12 }
  0x17   :  { %1025 = vmatprep.mubr.msk.f32.mxu1 %vm53_vm0, %v26_v12 }
  0x19   :  { %970 = vmatmul.mubr.msk.f32.gmra.mrb[10].mxu0 %vm53_vm0, %v27_v13 }
  0x1a   :  { %1026 = vmatmul.mubr.msk.f32.gmra.mrb[10].mxu1 %vm53_vm0, %v27_v13  ;;  %972 = vmatprep.mubr.msk.f32.mxu0 %vm53_vm0, %v28_v14 }
  0x1b   :  { %1028 = vmatprep.mubr.msk.f32.mxu1 %vm53_vm0, %v28_v14 }
  0x1d   :  { %973 = vmatmul.mubr.msk.f32.gmra.mrb[12].mxu0 %vm53_vm0, %v29_v15 }
  0x1e   :  { %1029 = vmatmul.mubr.msk.f32.gmra.mrb[12].mxu1 %vm53_vm0, %v29_v15  ;;  %975 = vmatprep.mubr.msk.f32.mxu0 %vm53_vm0, %v30_v16 }
  0x1f   :  { %1031 = vmatprep.mubr.msk.f32.mxu1 %vm53_vm0, %v30_v16 }
  0x21   :  { %976 = vmatmul.mubr.msk.f32.gmra.mrb[14].mxu0 %vm53_vm0, %v31_v17 }
  0x22   :  { %1032 = vmatmul.mubr.msk.f32.gmra.mrb[14].mxu1 %vm53_vm0, %v31_v17  ;;  %978 = vmatprep.mubr.msk.f32.mxu0 %vm53_vm0, %v32_v18 }
  0x23   :  { %1034 = vmatprep.mubr.msk.f32.mxu1 %vm53_vm0, %v32_v18 }
  0x25   :  { %979 = vmatmul.mubr.msk.f32.gmra.mrb[16].mxu0 %vm53_vm0, %v33_v19 }
  0x26   :  { %1035 = vmatmul.mubr.msk.f32.gmra.mrb[16].mxu1 %vm53_vm0, %v33_v19  ;;  %981 = vmatprep.mubr.msk.f32.mxu0 %vm53_vm0, %v34_v20 }
  0x27   :  { %1037 = vmatprep.mubr.msk.f32.mxu1 %vm53_vm0, %v34_v20 }
  0x29   :  { %982 = vmatmul.mubr.msk.f32.gmra.mrb[18].mxu0 %vm53_vm0, %v35_v21 }
  0x2a   :  { %1038 = vmatmul.mubr.msk.f32.gmra.mrb[18].mxu1 %vm53_vm0, %v35_v21  ;;  %984 = vmatprep.mubr.msk.f32.mxu0 %vm53_vm0, %v36_v22 }
  0x2b   :  { %1040 = vmatprep.mubr.msk.f32.mxu1 %vm53_vm0, %v36_v22 }
  0x2d   :  { %985 = vmatmul.mubr.msk.f32.gmra.mrb[20].mxu0 %vm53_vm0, %v37_v23 }
  0x2e   :  { %1041 = vmatmul.mubr.msk.f32.gmra.mrb[20].mxu1 %vm53_vm0, %v37_v23  ;;  %987 = vmatprep.mubr.msk.f32.mxu0 %vm53_vm0, %v38_v24 }
  0x2f   :  { %1043 = vmatprep.mubr.msk.f32.mxu1 %vm53_vm0, %v38_v24 }
  0x31   :  { %988 = vmatmul.mubr.msk.f32.gmra.mrb[22].mxu0 %vm53_vm0, %v39_v25 }
  0x32   :  { %1044 = vmatmul.mubr.msk.f32.gmra.mrb[22].mxu1 %vm53_vm0, %v39_v25  ;;  %990 = vmatprep.mubr.msk.f32.mxu0 %vm53_vm0, %v40_v26 }
  0x33   :  { %1046 = vmatprep.mubr.msk.f32.mxu1 %vm53_vm0, %v40_v26 }
  0x35   :  { %991 = vmatmul.mubr.msk.f32.gmra.mrb[24].mxu0 %vm53_vm0, %v41_v27 }
  0x36   :  { %1047 = vmatmul.mubr.msk.f32.gmra.mrb[24].mxu1 %vm53_vm0, %v41_v27  ;;  %993 = vmatprep.mubr.msk.f32.mxu0 %vm53_vm0, %v42_v28 }
  0x37   :  { %1049 = vmatprep.mubr.msk.f32.mxu1 %vm53_vm0, %v42_v28 }
  0x39   :  { %994 = vmatmul.mubr.msk.f32.gmra.mrb[26].mxu0 %vm53_vm0, %v43_v29 }
  0x3a   :  { %1050 = vmatmul.mubr.msk.f32.gmra.mrb[26].mxu1 %vm53_vm0, %v43_v29  ;;  %996 = vmatprep.mubr.msk.f32.mxu0 %vm53_vm0, %v44_v30 }
  0x3b   :  { %1052 = vmatprep.mubr.msk.f32.mxu1 %vm53_vm0, %v44_v30 }
  0x3d   :  { %997 = vmatmul.mubr.msk.f32.gmra.mrb[28].mxu0 %vm53_vm0, %v45_v31 }
  0x3e   :  { %1053 = vmatmul.mubr.msk.f32.gmra.mrb[28].mxu1 %vm53_vm0, %v45_v31  ;;  %999 = vmatprep.mubr.msk.f32.mxu0 %vm53_vm0, %v46_v32 }
  0x3f   :  { %1055 = vmatprep.mubr.msk.f32.mxu1 %vm53_vm0, %v46_v32 }
  0x41   :  { %1000 = vmatmul.mubr.msk.f32.gmra.mrb[30].mxu0 %vm53_vm0, %v47_v33 }
  0x42   :  { %1056 = vmatmul.mubr.msk.f32.gmra.mrb[30].mxu1 %vm53_vm0, %v47_v33  ;;  %1002 = vmatprep.mubr.msk.f32.mxu0 %vm53_vm0, %v48_v34 }
  0x43   :  { %1058 = vmatprep.mubr.msk.f32.mxu1 %vm53_vm0, %v48_v34 }
  0x45   :  { %1003 = vmatmul.mubr.msk.f32.gmra.mrb[32].mxu0 %vm53_vm0, %v49_v35 }
  0x46   :  { %1059 = vmatmul.mubr.msk.f32.gmra.mrb[32].mxu1 %vm53_vm0, %v49_v35  ;;  %1005 = vmatprep.mubr.msk.f32.mxu0 %vm53_vm0, %v50_v36 }
  0x47   :  { %1061 = vmatprep.mubr.msk.f32.mxu1 %vm53_vm0, %v50_v36 }
  0x49   :  { %1006 = vmatmul.mubr.msk.f32.gmra.mrb[34].mxu0 %vm53_vm0, %v51_v37 }
  0x4a   :  { %1062 = vmatmul.mubr.msk.f32.gmra.mrb[34].mxu1 %vm53_vm0, %v51_v37 }
  0xd8   :  { %v956_v38 = vpop.f32.mrb[0].mxu0 }
  0xd9   :  { %v1012_v39 = vpop.f32.mrb[0].mxu1  ;;  %v654_v40 = vmax.f32 %v956_v38, 0.0  ;;  %v228_v42 = vpop.f32.mrb[1].mxu0 }
  0xda   :  { %v727_v41 = vmax.f32 %v1012_v39, 0.0  ;;  %v474_v43 = vpop.f32.mrb[1].mxu1  ;;  %v653_v44 = vmax.f32 %v228_v42, 0.0 }
  0xdb   :  { %v726_v45 = vmax.f32 %v474_v43, 0.0  ;;  %691 = vst.msk [vmem:[%s1566_s3 + $0x8] sm:$0xff] %vm689_vm1, %v654_v40 }
  0xdc   :  { %763 = vst.msk [vmem:[%s1567_s4 + $0x8] sm:$0xff] %vm689_vm1, %v727_v41  ;;  %690 = vst.msk [vmem:[%s1566_s3] sm:$0xff] %vm689_vm1, %v653_v44  ;;  %v959_v46 = vpop.f32.mrb[2].mxu0 }
  0xdd   :  { %762 = vst.msk [vmem:[%s1567_s4] sm:$0xff] %vm689_vm1, %v726_v45  ;;  %v1015_v47 = vpop.f32.mrb[2].mxu1  ;;  %v656_v48 = vmax.f32 %v959_v46, 0.0  ;;  %v238_v50 = vpop.f32.mrb[3].mxu0 }
  0xde   :  { %v729_v49 = vmax.f32 %v1015_v47, 0.0  ;;  %v484_v51 = vpop.f32.mrb[3].mxu1  ;;  %v655_v52 = vmax.f32 %v238_v50, 0.0 }
  0xdf   :  { %v728_v53 = vmax.f32 %v484_v51, 0.0  ;;  %693 = vst.msk [vmem:[%s1566_s3 + $0x18] sm:$0xff] %vm689_vm1, %v656_v48 }
  0xe0   :  { %765 = vst.msk [vmem:[%s1567_s4 + $0x18] sm:$0xff] %vm689_vm1, %v729_v49  ;;  %692 = vst.msk [vmem:[%s1566_s3 + $0x10] sm:$0xff] %vm689_vm1, %v655_v52  ;;  %v962_v54 = vpop.f32.mrb[4].mxu0 }
  0xe1   :  { %764 = vst.msk [vmem:[%s1567_s4 + $0x10] sm:$0xff] %vm689_vm1, %v728_v53  ;;  %v1018_v55 = vpop.f32.mrb[4].mxu1  ;;  %v658_v56 = vmax.f32 %v962_v54, 0.0  ;;  %v248_v58 = vpop.f32.mrb[5].mxu0 }
  0xe2   :  { %v731_v57 = vmax.f32 %v1018_v55, 0.0  ;;  %v494_v59 = vpop.f32.mrb[5].mxu1  ;;  %v657_v60 = vmax.f32 %v248_v58, 0.0 }
  0xe3   :  { %v730_v61 = vmax.f32 %v494_v59, 0.0  ;;  %695 = vst.msk [vmem:[%s1566_s3 + $0x28] sm:$0xff] %vm689_vm1, %v658_v56 }
  0xe4   :  { %767 = vst.msk [vmem:[%s1567_s4 + $0x28] sm:$0xff] %vm689_vm1, %v731_v57  ;;  %694 = vst.msk [vmem:[%s1566_s3 + $0x20] sm:$0xff] %vm689_vm1, %v657_v60  ;;  %v965_v62 = vpop.f32.mrb[6].mxu0 }
  0xe5   :  { %766 = vst.msk [vmem:[%s1567_s4 + $0x20] sm:$0xff] %vm689_vm1, %v730_v61  ;;  %v1021_v63 = vpop.f32.mrb[6].mxu1  ;;  %v660_v0 = vmax.f32 %v965_v62, 0.0  ;;  %v258_v2 = vpop.f32.mrb[7].mxu0 }
  0xe6   :  { %v733_v1 = vmax.f32 %v1021_v63, 0.0  ;;  %v504_v3 = vpop.f32.mrb[7].mxu1  ;;  %v659_v4 = vmax.f32 %v258_v2, 0.0 }
  0xe7   :  { %v732_v5 = vmax.f32 %v504_v3, 0.0  ;;  %697 = vst.msk [vmem:[%s1566_s3 + $0x38] sm:$0xff] %vm689_vm1, %v660_v0 }
  0xe8   :  { %769 = vst.msk [vmem:[%s1567_s4 + $0x38] sm:$0xff] %vm689_vm1, %v733_v1  ;;  %696 = vst.msk [vmem:[%s1566_s3 + $0x30] sm:$0xff] %vm689_vm1, %v659_v4  ;;  %v968_v6 = vpop.f32.mrb[8].mxu0 }
  0xe9   :  { %768 = vst.msk [vmem:[%s1567_s4 + $0x30] sm:$0xff] %vm689_vm1, %v732_v5  ;;  %v1024_v7 = vpop.f32.mrb[8].mxu1  ;;  %v662_v8 = vmax.f32 %v968_v6, 0.0  ;;  %v268_v10 = vpop.f32.mrb[9].mxu0 }
  0xea   :  { %v735_v9 = vmax.f32 %v1024_v7, 0.0  ;;  %v514_v11 = vpop.f32.mrb[9].mxu1  ;;  %v661_v12 = vmax.f32 %v268_v10, 0.0 }
  0xeb   :  { %v734_v13 = vmax.f32 %v514_v11, 0.0  ;;  %699 = vst.msk [vmem:[%s1566_s3 + $0x48] sm:$0xff] %vm689_vm1, %v662_v8 }
  0xec   :  { %771 = vst.msk [vmem:[%s1567_s4 + $0x48] sm:$0xff] %vm689_vm1, %v735_v9  ;;  %698 = vst.msk [vmem:[%s1566_s3 + $0x40] sm:$0xff] %vm689_vm1, %v661_v12  ;;  %v971_v14 = vpop.f32.mrb[10].mxu0 }
  0xed   :  { %770 = vst.msk [vmem:[%s1567_s4 + $0x40] sm:$0xff] %vm689_vm1, %v734_v13  ;;  %v1027_v15 = vpop.f32.mrb[10].mxu1  ;;  %v664_v16 = vmax.f32 %v971_v14, 0.0  ;;  %v278_v18 = vpop.f32.mrb[11].mxu0 }
  0xee   :  { %v737_v17 = vmax.f32 %v1027_v15, 0.0  ;;  %v524_v19 = vpop.f32.mrb[11].mxu1  ;;  %v663_v20 = vmax.f32 %v278_v18, 0.0 }
  0xef   :  { %v736_v21 = vmax.f32 %v524_v19, 0.0  ;;  %701 = vst.msk [vmem:[%s1566_s3 + $0x58] sm:$0xff] %vm689_vm1, %v664_v16 }
  0xf0   :  { %773 = vst.msk [vmem:[%s1567_s4 + $0x58] sm:$0xff] %vm689_vm1, %v737_v17  ;;  %700 = vst.msk [vmem:[%s1566_s3 + $0x50] sm:$0xff] %vm689_vm1, %v663_v20  ;;  %v974_v22 = vpop.f32.mrb[12].mxu0 }
  0xf1   :  { %772 = vst.msk [vmem:[%s1567_s4 + $0x50] sm:$0xff] %vm689_vm1, %v736_v21  ;;  %v1030_v23 = vpop.f32.mrb[12].mxu1  ;;  %v666_v24 = vmax.f32 %v974_v22, 0.0  ;;  %v288_v26 = vpop.f32.mrb[13].mxu0 }
  0xf2   :  { %v739_v25 = vmax.f32 %v1030_v23, 0.0  ;;  %v534_v27 = vpop.f32.mrb[13].mxu1  ;;  %v665_v28 = vmax.f32 %v288_v26, 0.0 }
  0xf3   :  { %v738_v29 = vmax.f32 %v534_v27, 0.0  ;;  %703 = vst.msk [vmem:[%s1566_s3 + $0x68] sm:$0xff] %vm689_vm1, %v666_v24 }
  0xf4   :  { %775 = vst.msk [vmem:[%s1567_s4 + $0x68] sm:$0xff] %vm689_vm1, %v739_v25  ;;  %702 = vst.msk [vmem:[%s1566_s3 + $0x60] sm:$0xff] %vm689_vm1, %v665_v28  ;;  %v977_v30 = vpop.f32.mrb[14].mxu0 }
  0xf5   :  { %774 = vst.msk [vmem:[%s1567_s4 + $0x60] sm:$0xff] %vm689_vm1, %v738_v29  ;;  %v1033_v31 = vpop.f32.mrb[14].mxu1  ;;  %v668_v32 = vmax.f32 %v977_v30, 0.0  ;;  %v298_v34 = vpop.f32.mrb[15].mxu0 }
  0xf6   :  { %v741_v33 = vmax.f32 %v1033_v31, 0.0  ;;  %v544_v35 = vpop.f32.mrb[15].mxu1  ;;  %v667_v36 = vmax.f32 %v298_v34, 0.0 }
  0xf7   :  { %v740_v37 = vmax.f32 %v544_v35, 0.0  ;;  %705 = vst.msk [vmem:[%s1566_s3 + $0x78] sm:$0xff] %vm689_vm1, %v668_v32 }
  0xf8   :  { %777 = vst.msk [vmem:[%s1567_s4 + $0x78] sm:$0xff] %vm689_vm1, %v741_v33  ;;  %704 = vst.msk [vmem:[%s1566_s3 + $0x70] sm:$0xff] %vm689_vm1, %v667_v36  ;;  %v980_v38 = vpop.f32.mrb[16].mxu0 }
  0xf9   :  { %776 = vst.msk [vmem:[%s1567_s4 + $0x70] sm:$0xff] %vm689_vm1, %v740_v37  ;;  %v1036_v39 = vpop.f32.mrb[16].mxu1  ;;  %v670_v40 = vmax.f32 %v980_v38, 0.0  ;;  %v308_v42 = vpop.f32.mrb[17].mxu0 }
  0xfa   :  { %v743_v41 = vmax.f32 %v1036_v39, 0.0  ;;  %v554_v43 = vpop.f32.mrb[17].mxu1  ;;  %v669_v44 = vmax.f32 %v308_v42, 0.0 }
  0xfb   :  { %v742_v45 = vmax.f32 %v554_v43, 0.0  ;;  %707 = vst.msk [vmem:[%s1566_s3 + $0x88] sm:$0xff] %vm689_vm1, %v670_v40 }
  0xfc   :  { %779 = vst.msk [vmem:[%s1567_s4 + $0x88] sm:$0xff] %vm689_vm1, %v743_v41  ;;  %706 = vst.msk [vmem:[%s1566_s3 + $0x80] sm:$0xff] %vm689_vm1, %v669_v44  ;;  %v983_v46 = vpop.f32.mrb[18].mxu0 }
  0xfd   :  { %778 = vst.msk [vmem:[%s1567_s4 + $0x80] sm:$0xff] %vm689_vm1, %v742_v45  ;;  %v1039_v47 = vpop.f32.mrb[18].mxu1  ;;  %v672_v48 = vmax.f32 %v983_v46, 0.0  ;;  %v318_v50 = vpop.f32.mrb[19].mxu0 }
  0xfe   :  { %v745_v49 = vmax.f32 %v1039_v47, 0.0  ;;  %v564_v51 = vpop.f32.mrb[19].mxu1  ;;  %v671_v52 = vmax.f32 %v318_v50, 0.0 }
  0xff   :  { %v744_v53 = vmax.f32 %v564_v51, 0.0  ;;  %709 = vst.msk [vmem:[%s1566_s3 + $0x98] sm:$0xff] %vm689_vm1, %v672_v48 }
 0x100   :  { %781 = vst.msk [vmem:[%s1567_s4 + $0x98] sm:$0xff] %vm689_vm1, %v745_v49  ;;  %708 = vst.msk [vmem:[%s1566_s3 + $0x90] sm:$0xff] %vm689_vm1, %v671_v52  ;;  %v986_v54 = vpop.f32.mrb[20].mxu0 }
 0x101   :  { %780 = vst.msk [vmem:[%s1567_s4 + $0x90] sm:$0xff] %vm689_vm1, %v744_v53  ;;  %v1042_v55 = vpop.f32.mrb[20].mxu1  ;;  %v674_v56 = vmax.f32 %v986_v54, 0.0  ;;  %v328_v58 = vpop.f32.mrb[21].mxu0 }
 0x102   :  { %v747_v57 = vmax.f32 %v1042_v55, 0.0  ;;  %v574_v59 = vpop.f32.mrb[21].mxu1  ;;  %v673_v60 = vmax.f32 %v328_v58, 0.0 }
 0x103   :  { %v746_v61 = vmax.f32 %v574_v59, 0.0  ;;  %711 = vst.msk [vmem:[%s1566_s3 + $0xa8] sm:$0xff] %vm689_vm1, %v674_v56 }
 0x104   :  { %783 = vst.msk [vmem:[%s1567_s4 + $0xa8] sm:$0xff] %vm689_vm1, %v747_v57  ;;  %710 = vst.msk [vmem:[%s1566_s3 + $0xa0] sm:$0xff] %vm689_vm1, %v673_v60  ;;  %v989_v62 = vpop.f32.mrb[22].mxu0 }
 0x105   :  { %782 = vst.msk [vmem:[%s1567_s4 + $0xa0] sm:$0xff] %vm689_vm1, %v746_v61  ;;  %v1045_v63 = vpop.f32.mrb[22].mxu1  ;;  %v676_v0 = vmax.f32 %v989_v62, 0.0  ;;  %v338_v2 = vpop.f32.mrb[23].mxu0 }
 0x106   :  { %v749_v1 = vmax.f32 %v1045_v63, 0.0  ;;  %v584_v3 = vpop.f32.mrb[23].mxu1  ;;  %v675_v4 = vmax.f32 %v338_v2, 0.0 }
 0x107   :  { %v748_v5 = vmax.f32 %v584_v3, 0.0  ;;  %713 = vst.msk [vmem:[%s1566_s3 + $0xb8] sm:$0xff] %vm689_vm1, %v676_v0 }
 0x108   :  { %785 = vst.msk [vmem:[%s1567_s4 + $0xb8] sm:$0xff] %vm689_vm1, %v749_v1  ;;  %712 = vst.msk [vmem:[%s1566_s3 + $0xb0] sm:$0xff] %vm689_vm1, %v675_v4  ;;  %v992_v6 = vpop.f32.mrb[24].mxu0 }
 0x109   :  { %784 = vst.msk [vmem:[%s1567_s4 + $0xb0] sm:$0xff] %vm689_vm1, %v748_v5  ;;  %v1048_v7 = vpop.f32.mrb[24].mxu1  ;;  %v678_v8 = vmax.f32 %v992_v6, 0.0  ;;  %v348_v10 = vpop.f32.mrb[25].mxu0 }
 0x10a   :  { %v751_v9 = vmax.f32 %v1048_v7, 0.0  ;;  %v594_v11 = vpop.f32.mrb[25].mxu1  ;;  %v677_v12 = vmax.f32 %v348_v10, 0.0 }
 0x10b   :  { %v750_v13 = vmax.f32 %v594_v11, 0.0  ;;  %715 = vst.msk [vmem:[%s1566_s3 + $0xc8] sm:$0xff] %vm689_vm1, %v678_v8 }
 0x10c   :  { %787 = vst.msk [vmem:[%s1567_s4 + $0xc8] sm:$0xff] %vm689_vm1, %v751_v9  ;;  %714 = vst.msk [vmem:[%s1566_s3 + $0xc0] sm:$0xff] %vm689_vm1, %v677_v12  ;;  %v995_v14 = vpop.f32.mrb[26].mxu0 }
 0x10d   :  { %786 = vst.msk [vmem:[%s1567_s4 + $0xc0] sm:$0xff] %vm689_vm1, %v750_v13  ;;  %v1051_v15 = vpop.f32.mrb[26].mxu1  ;;  %v680_v16 = vmax.f32 %v995_v14, 0.0  ;;  %v358_v18 = vpop.f32.mrb[27].mxu0 }
 0x10e   :  { %v753_v17 = vmax.f32 %v1051_v15, 0.0  ;;  %v604_v19 = vpop.f32.mrb[27].mxu1  ;;  %v679_v20 = vmax.f32 %v358_v18, 0.0 }
 0x10f   :  { %v752_v21 = vmax.f32 %v604_v19, 0.0  ;;  %717 = vst.msk [vmem:[%s1566_s3 + $0xd8] sm:$0xff] %vm689_vm1, %v680_v16 }
 0x110   :  { %789 = vst.msk [vmem:[%s1567_s4 + $0xd8] sm:$0xff] %vm689_vm1, %v753_v17  ;;  %716 = vst.msk [vmem:[%s1566_s3 + $0xd0] sm:$0xff] %vm689_vm1, %v679_v20  ;;  %v998_v22 = vpop.f32.mrb[28].mxu0 }
 0x111   :  { %788 = vst.msk [vmem:[%s1567_s4 + $0xd0] sm:$0xff] %vm689_vm1, %v752_v21  ;;  %v1054_v23 = vpop.f32.mrb[28].mxu1  ;;  %v682_v24 = vmax.f32 %v998_v22, 0.0  ;;  %v368_v26 = vpop.f32.mrb[29].mxu0 }
 0x112   :  { %v755_v25 = vmax.f32 %v1054_v23, 0.0  ;;  %v614_v27 = vpop.f32.mrb[29].mxu1  ;;  %v681_v28 = vmax.f32 %v368_v26, 0.0 }
 0x113   :  { %v754_v29 = vmax.f32 %v614_v27, 0.0  ;;  %719 = vst.msk [vmem:[%s1566_s3 + $0xe8] sm:$0xff] %vm689_vm1, %v682_v24 }
 0x114   :  { %791 = vst.msk [vmem:[%s1567_s4 + $0xe8] sm:$0xff] %vm689_vm1, %v755_v25  ;;  %718 = vst.msk [vmem:[%s1566_s3 + $0xe0] sm:$0xff] %vm689_vm1, %v681_v28  ;;  %v1001_v30 = vpop.f32.mrb[30].mxu0 }
 0x115   :  { %790 = vst.msk [vmem:[%s1567_s4 + $0xe0] sm:$0xff] %vm689_vm1, %v754_v29  ;;  %v1057_v31 = vpop.f32.mrb[30].mxu1  ;;  %v684_v32 = vmax.f32 %v1001_v30, 0.0  ;;  %v378_v34 = vpop.f32.mrb[31].mxu0 }
 0x116   :  { %v757_v33 = vmax.f32 %v1057_v31, 0.0  ;;  %v624_v35 = vpop.f32.mrb[31].mxu1  ;;  %v683_v36 = vmax.f32 %v378_v34, 0.0 }
 0x117   :  { %v756_v37 = vmax.f32 %v624_v35, 0.0  ;;  %721 = vst.msk [vmem:[%s1566_s3 + $0xf8] sm:$0xff] %vm689_vm1, %v684_v32 }
 0x118   :  { %793 = vst.msk [vmem:[%s1567_s4 + $0xf8] sm:$0xff] %vm689_vm1, %v757_v33  ;;  %720 = vst.msk [vmem:[%s1566_s3 + $0xf0] sm:$0xff] %vm689_vm1, %v683_v36  ;;  %v1004_v38 = vpop.f32.mrb[32].mxu0 }
 0x119   :  { %792 = vst.msk [vmem:[%s1567_s4 + $0xf0] sm:$0xff] %vm689_vm1, %v756_v37  ;;  %v1060_v39 = vpop.f32.mrb[32].mxu1  ;;  %v686_v40 = vmax.f32 %v1004_v38, 0.0  ;;  %v388_v42 = vpop.f32.mrb[33].mxu0 }
 0x11a   :  { %v759_v41 = vmax.f32 %v1060_v39, 0.0  ;;  %v634_v43 = vpop.f32.mrb[33].mxu1  ;;  %v685_v44 = vmax.f32 %v388_v42, 0.0 }
 0x11b   :  { %v758_v45 = vmax.f32 %v634_v43, 0.0  ;;  %723 = vst.msk [vmem:[%s1566_s3 + $0x108] sm:$0xff] %vm689_vm1, %v686_v40 }
 0x11c   :  { %795 = vst.msk [vmem:[%s1567_s4 + $0x108] sm:$0xff] %vm689_vm1, %v759_v41  ;;  %722 = vst.msk [vmem:[%s1566_s3 + $0x100] sm:$0xff] %vm689_vm1, %v685_v44  ;;  %v1007_v46 = vpop.f32.mrb[34].mxu0 }
 0x11d   :  { %794 = vst.msk [vmem:[%s1567_s4 + $0x100] sm:$0xff] %vm689_vm1, %v758_v45  ;;  %v1063_v47 = vpop.f32.mrb[34].mxu1  ;;  %v688_v48 = vmax.f32 %v1007_v46, 0.0  ;;  %v398_v50 = vpop.f32.mrb[35].mxu0 }
 0x11e   :  { %v761_v49 = vmax.f32 %v1063_v47, 0.0  ;;  %v644_v51 = vpop.f32.mrb[35].mxu1  ;;  %v687_v52 = vmax.f32 %v398_v50, 0.0 }
 0x11f   :  { %v760_v53 = vmax.f32 %v644_v51, 0.0  ;;  %725 = vst.msk [vmem:[%s1566_s3 + $0x118] sm:$0xff] %vm689_vm1, %v688_v48 }
 0x120   :  { %797 = vst.msk [vmem:[%s1567_s4 + $0x118] sm:$0xff] %vm689_vm1, %v761_v49  ;;  %724 = vst.msk [vmem:[%s1566_s3 + $0x110] sm:$0xff] %vm689_vm1, %v687_v52 }
 0x121   :  { %796 = vst.msk [vmem:[%s1567_s4 + $0x110] sm:$0xff] %vm689_vm1, %v760_v53 }

</bundles_post_ra>
